<compile_context>
chip_gen: v7x
topology: tpu7x:2x2x1
jax: 0.10.0
libtpu: 0.0.40
codegen_flags: <defaults>
</compile_context>

<pallas_src>
import jax
import jax.numpy as jnp
from jax.experimental import pallas as pl
from jax.experimental.pallas import tpu as pltpu


# ----------------------------------------------------------------------------
# Pallas kernel: the synthetic "bmodel" compute  y = relu(x @ W + b)
# ----------------------------------------------------------------------------
def _mm_bias_relu_kernel(x_ref, w_ref, b_ref, o_ref):
    """One (i, j, k) grid step of y = relu(x @ w + b).

    The output tile (i, j) stays VMEM-resident across the innermost k axis,
    so we accumulate directly into o_ref (no scratch) and apply bias + relu
    only in the k == last epilogue.
    """
    k = pl.program_id(2)

    @pl.when(k == 0)
    def _init():
        o_ref[...] = jnp.zeros_like(o_ref)

    # MXU matmul with f32 accumulation into the resident output tile.
    o_ref[...] += jnp.dot(x_ref[...], w_ref[...],
                          preferred_element_type=jnp.float32)

    @pl.when(k == pl.num_programs(2) - 1)
    def _finalize():
        o_ref[...] = jnp.maximum(o_ref[...] + b_ref[...], 0.0)


# ----------------------------------------------------------------------------
# Tiling helpers
# ----------------------------------------------------------------------------
def _round_up(v, m):
    return ((v + m - 1) // m) * m


def _pick_tile(dim, candidates):
    """Largest candidate tile that evenly divides `dim`; fall back to dim."""
    for t in candidates:
        if t <= dim and dim % t == 0:
            return t
    return dim


_VMEM_BUDGET = 24 * 1024 * 1024  # headroom under the 32 MiB scoped limit (v7x-safe)


def net_forward(x, w, b, *, operand_dtype=None):
    """Tiled Pallas matmul+bias+relu: (M, K) x (K, N) + (1, N) -> (M, N) f32.

    operand_dtype=jnp.bfloat16 casts x / W for the matmul (f32 accumulation
    kept) — halves weight/activation HBM traffic on v6e/v7x.
    """
    M, K = x.shape
    K2, N = w.shape
    assert K == K2 and b.shape == (1, N)

    # Lane-density guard: pad K / N up to multiples of 128 so every tile is
    # lane-dense (no masked vst on the output) regardless of caller shapes.
    Kp, Np = _round_up(K, 128), _round_up(N, 128)
    if Kp != K:
        x = jnp.pad(x, ((0, 0), (0, Kp - K)))
        w = jnp.pad(w, ((0, Kp - K), (0, 0)))
    if Np != N:
        w = jnp.pad(w, ((0, 0), (0, Np - N)))
        b = jnp.pad(b, ((0, 0), (0, Np - N)))

    if operand_dtype is not None:
        x = x.astype(operand_dtype)
        w = w.astype(operand_dtype)
    x_bytes = jnp.dtype(x.dtype).itemsize
    w_bytes = jnp.dtype(w.dtype).itemsize

    # Large tiles: small problems collapse to a single grid step (per-step
    # overhead dominates there) and DMAs stay big and contiguous.
    tm = _pick_tile(M, (512, 256, 128, 64, 32, 16, 8))
    tn = _pick_tile(Np, (512, 256, 128))
    tk = _pick_tile(Kp, (1024, 512, 256, 128))

    # Keep the tile footprint (double-buffered inputs + resident f32 out tile)
    # well under the scoped VMEM limit.
    def _footprint(tm_, tn_, tk_):
        return (2 * (tm_ * tk_ * x_bytes + tk_ * tn_ * w_bytes + tn_ * 4)
                + tm_ * tn_ * 4)

    def _shrink(val, dim, cands):
        for c in cands:
            if c < val and dim % c == 0:
                return c
        return val

    while _footprint(tm, tn, tk) > _VMEM_BUDGET:
        if tk > 128:
            tk = _shrink(tk, Kp, (512, 256, 128))
        elif tn > 128:
            tn = _shrink(tn, Np, (256, 128))
        else:
            new_tm = _shrink(tm, M, (256, 128, 64, 32, 16, 8))
            if new_tm == tm:
                break
            tm = new_tm

    gm, gn, gk = M // tm, Np // tn, Kp // tk
    grid = (gm, gn, gk)

    # Megacore sharding only where it pays: thin-M shapes must not split a
    # tiny N axis across TensorCores (each core would fall below DMA/launch
    # overhead); degenerate (size-1) axes are marked arbitrary.
    thin_m = M <= 64
    m_sem = "parallel" if gm > 1 else "arbitrary"
    n_sem = "parallel" if (gn > 1 and not thin_m) else "arbitrary"

    # Weight-stream prefetch depth: thin-M + many reduction steps means the
    # tk*tn DMA, not the MXU, is the critical path — deepen to 3 buffers.
    if thin_m and gk >= 4:
        w_spec = pl.BlockSpec((tk, tn), lambda i, j, k: (k, j),
                              pipeline_mode=pl.Buffered(3))
    else:
        w_spec = pl.BlockSpec((tk, tn), lambda i, j, k: (k, j))

    # bytes_accessed includes the tiling re-fetch factors (advisory for XLA).
    cost = pl.CostEstimate(
        flops=2 * M * Np * Kp,
        transcendentals=0,
        bytes_accessed=(x_bytes * M * Kp * gn      # x re-fetched per N tile
                        + w_bytes * Kp * Np * gm   # W re-fetched per M tile
                        + 4 * Np * gm              # bias per (i, j) tile
                        + 4 * M * Np),             # output
    )

    out = pl.pallas_call(
        _mm_bias_relu_kernel,
        out_shape=jax.ShapeDtypeStruct((M, Np), jnp.float32),
        grid_spec=pltpu.PrefetchScalarGridSpec(
            num_scalar_prefetch=0,
            grid=grid,
            in_specs=[
                pl.BlockSpec((tm, tk), lambda i, j, k: (i, k)),
                w_spec,
                # Bias depends only on the N tile; not re-fetched per k step.
                pl.BlockSpec((1, tn), lambda i, j, k: (0, j)),
            ],
            out_specs=pl.BlockSpec((tm, tn), lambda i, j, k: (i, j)),
        ),
        compiler_params=pltpu.CompilerParams(
            dimension_semantics=(m_sem, n_sem, "arbitrary"),
            # Stay well under v7x's 64 MiB physical VMEM so multi-buffering
            # is never dropped.
            vmem_limit_bytes=32 * 1024 * 1024,
        ),
        cost_estimate=cost,
    )(x, w, b)

    if Np != N:
        out = out[:, :N]
    return out


# ----------------------------------------------------------------------------
# JAX/Pallas equivalent of TpuMlirModule
# ----------------------------------------------------------------------------
class TpuMlirModuleJax:
    """Mirrors TpuMlirModule.forward semantics with a synthetic Pallas net.

    The opaque compiled bmodel (`pyruntime_bm` engine) is replaced by a
    deterministic single-layer MLP whose forward pass is a Pallas TPU kernel.
    """

    def __init__(self,
                 in_tensor_name_to_idx_dict,
                 output_changed_shapes,
                 output_tensor_names=None,
                 output_dtypes=None,
                 return_none_count=0,
                 net_in_shape=(8, 512),
                 net_hidden=512,
                 operand_dtype=None):
        self.in_tensor_name_to_idx_dict = in_tensor_name_to_idx_dict
        self.output_changed_shapes = output_changed_shapes
        # Original module immediately overwrites output_tensor_names with None.
        self.output_tensor_names = None
        self.output_dtypes = output_dtypes
        self.return_none_count = return_none_count
        self.operand_dtype = operand_dtype

        # Synthetic "bmodel" net description: one input "x", one output "y".
        self.net_input_names = ["x"]
        self.net_input_shapes = {"x": tuple(net_in_shape)}
        self.net_output_names = ["y"]

        # Deterministic parameter init (stands in for the compiled engine
        # weights).  # TODO(synk): real bmodel weights come from a compiled
        # .bmodel engine file; no checkpoint is loaded here by design.
        K = net_in_shape[1]
        N = net_hidden
        wkey, bkey = jax.random.split(jax.random.PRNGKey(42))
        self.w = (jax.random.normal(wkey, (K, N), dtype=jnp.float32)
                  / jnp.sqrt(jnp.float32(K)))
        self.b = jax.random.normal(bkey, (1, N), dtype=jnp.float32) * 0.1

        self.initialized = True

    def _check_initialized(self):
        if not self.initialized:
            raise RuntimeError("TpuMlirModuleJax is not initialized.")

    def forward(self, *inputs):
        self._check_initialized()

        # --- ProcessInputs: gather by name, reshape to the net input shape ---
        new_inputs = []
        for name in self.net_input_names:
            x = inputs[self.in_tensor_name_to_idx_dict[name]]
            net_shape = self.net_input_shapes[name]
            if tuple(x.shape) != net_shape:
                x = jnp.reshape(x, net_shape)
            new_inputs.append(x)

        # --- TpuRuntime: the compiled-network forward -> Pallas kernel ---
        raw_outputs = {"y": net_forward(new_inputs[0], self.w, self.b,
                                        operand_dtype=self.operand_dtype)}

        # --- ProcessOutputs ---
        tpu_outputs = []
        for name in self.net_output_names:
            if (self.output_tensor_names is not None
                    and name not in self.output_tensor_names):
                continue
            out = raw_outputs[name]
            if name in self.output_changed_shapes:
                out = jnp.reshape(out, self.output_changed_shapes[name])
            if out.shape == (1,):
                out = out[0]
            tpu_outputs.append(out)

        if self.output_dtypes is not None:
            # Faithful to the original: the cast result is discarded (no-op).
            for out, dtype in zip(tpu_outputs, self.output_dtypes):
                if dtype == jnp.int64:
                    out = out.astype(jnp.int32)

        if self.return_none_count > 0:
            tpu_outputs.extend([None for _ in range(self.return_none_count)])

        if len(tpu_outputs) == 1:
            return tpu_outputs[0]
        return tuple(tpu_outputs)

    __call__ = forward


if __name__ == "__main__":
    # Caller-side input (2, 4, 32, 16) is reshaped by the wrapper to the net's
    # expected (M=8, K=512); the output (8, 512) is reshaped back to
    # (2, 4, 32, 16) via output_changed_shapes.  With tn=tk=512 the kernel now
    # runs a single (1, 1, 1) grid step: one contiguous weight DMA and the
    # init / accumulate / finalize path exercised in one invocation.
    B, C, Hs, Ws = 2, 4, 32, 16
    M, K = 8, 512
    N = 512
    assert B * C * Hs * Ws == M * K == M * N

    key = jax.random.PRNGKey(0)
    x = jax.random.normal(key, (B, C, Hs, Ws), dtype=jnp.float32)

    module = TpuMlirModuleJax(
        in_tensor_name_to_idx_dict={"x": 0},
        output_changed_shapes={"y": (B, C, Hs, Ws)},
        output_dtypes=[jnp.float32],
        return_none_count=0,
        net_in_shape=(M, K),
        net_hidden=N,
    )

    out = module(x)
    out = jax.block_until_ready(out)

    # Correctness check (f32 path) against a pure-JAX reference.
    x2d = x.reshape(M, K)
    ref2d = jnp.maximum(x2d @ module.w + module.b, 0.0)
    ref = jax.block_until_ready(ref2d.reshape(B, C, Hs, Ws))

    assert out.shape == (B, C, Hs, Ws)
    assert out.dtype == jnp.float32
    assert jnp.allclose(out, ref, atol=1e-3, rtol=1e-3)

    # Fast-path sanity check: bf16 operands (v6e/v7x), f32 accumulation.
    y_bf16 = net_forward(x2d, module.w, module.b, operand_dtype=jnp.bfloat16)
    y_bf16 = jax.block_until_ready(y_bf16)
    assert y_bf16.shape == (M, N) and y_bf16.dtype == jnp.float32
    assert jnp.allclose(y_bf16, ref2d, atol=5e-2, rtol=5e-2)

    print("KERNEL_OK")
</pallas_src>

<mosaic_0001>
module attributes {stable_mosaic.version = 11 : i64} {
  func.func @_mm_bias_relu_kernel(%arg0: i32, %arg1: i32, %arg2: i32, %arg3: memref<8x512xf32, #tpu.memory_space<vmem>>, %arg4: memref<512x512xf32, #tpu.memory_space<vmem>>, %arg5: memref<1x512xf32, #tpu.memory_space<vmem>>, %arg6: memref<8x512xf32, #tpu.memory_space<vmem>>) attributes {dimension_semantics = [#tpu.dimension_semantics<arbitrary>, #tpu.dimension_semantics<arbitrary>, #tpu.dimension_semantics<arbitrary>], iteration_bounds = array<i64: 1, 1, 1>, scalar_prefetch = 0 : i64, scratch_operands = 0 : i64, tpu.core_type = #tpu.core_type<tc>, window_params = [{transform_indices = @transform_0, window_bounds = array<i64: 8, 512>}, {transform_indices = @transform_1, window_bounds = array<i64: 512, 512>}, {transform_indices = @transform_2, window_bounds = array<i64: 1, 512>}, {transform_indices = @transform_3, window_bounds = array<i64: 8, 512>}]} {
    %c0_i32 = arith.constant 0 : i32
    %0 = arith.cmpi eq, %arg2, %c0_i32 : i32
    %1 = arith.extui %0 : i1 to i32
    %c0_i32_0 = arith.constant 0 : i32
    %2 = arith.cmpi ne, %1, %c0_i32_0 : i32
    scf.if %2 {
      %cst_10 = arith.constant 0.000000e+00 : f32
      %12 = vector.broadcast %cst_10 : f32 to vector<8x512xf32>
      %c0_11 = arith.constant 0 : index
      %c0_12 = arith.constant 0 : index
      %13 = vector.load %arg6[%c0_11, %c0_12] : memref<8x512xf32, #tpu.memory_space<vmem>>, vector<8x512xf32>
      tpu.vector_store %arg6[%c0_11, %c0_12], %12 {strides = array<i32>} : memref<8x512xf32, #tpu.memory_space<vmem>>, vector<8x512xf32>,
    } else {
    }
    %c0 = arith.constant 0 : index
    %c0_1 = arith.constant 0 : index
    %3 = vector.load %arg6[%c0, %c0_1] : memref<8x512xf32, #tpu.memory_space<vmem>>, vector<8x512xf32>
    %c0_2 = arith.constant 0 : index
    %c0_3 = arith.constant 0 : index
    %4 = vector.load %arg3[%c0_2, %c0_3] : memref<8x512xf32, #tpu.memory_space<vmem>>, vector<8x512xf32>
    %c0_4 = arith.constant 0 : index
    %c0_5 = arith.constant 0 : index
    %5 = vector.load %arg4[%c0_4, %c0_5] : memref<512x512xf32, #tpu.memory_space<vmem>>, vector<512x512xf32>
    %cst = arith.constant dense<0.000000e+00> : vector<8x512xf32>
    %6 = tpu.matmul %4, %5, %cst {dimension_numbers = #tpu.dot_dimension_numbers<[1], [0], [0], [1], [0, 0, 1, 1], [], []>} : vector<8x512xf32>, vector<512x512xf32>, vector<8x512xf32> -> vector<8x512xf32>
    %7 = arith.addf %3, %6 : vector<8x512xf32>
    %c0_6 = arith.constant 0 : index
    %c0_7 = arith.constant 0 : index
    %8 = vector.load %arg6[%c0_6, %c0_7] : memref<8x512xf32, #tpu.memory_space<vmem>>, vector<8x512xf32>
    tpu.vector_store %arg6[%c0_6, %c0_7], %7 {strides = array<i32>} : memref<8x512xf32, #tpu.memory_space<vmem>>, vector<8x512xf32>,
    %c0_i32_8 = arith.constant 0 : i32
    %9 = arith.cmpi eq, %arg2, %c0_i32_8 : i32
    %10 = arith.extui %9 : i1 to i32
    %c0_i32_9 = arith.constant 0 : i32
    %11 = arith.cmpi ne, %10, %c0_i32_9 : i32
    scf.if %11 {
      %c0_10 = arith.constant 0 : index
      %c0_11 = arith.constant 0 : index
      %12 = vector.load %arg6[%c0_10, %c0_11] : memref<8x512xf32, #tpu.memory_space<vmem>>, vector<8x512xf32>
      %c0_12 = arith.constant 0 : index
      %c0_13 = arith.constant 0 : index
      %13 = vector.load %arg5[%c0_12, %c0_13] : memref<1x512xf32, #tpu.memory_space<vmem>>, vector<1x512xf32>
      %14 = vector.broadcast %13 : vector<1x512xf32> to vector<8x512xf32>
      %15 = arith.addf %12, %14 : vector<8x512xf32>
      %cst_14 = arith.constant 0.000000e+00 : f32
      %16 = vector.broadcast %cst_14 : f32 to vector<8x512xf32>
      %17 = arith.maximumf %15, %16 : vector<8x512xf32>
      %c0_15 = arith.constant 0 : index
      %c0_16 = arith.constant 0 : index
      %18 = vector.load %arg6[%c0_15, %c0_16] : memref<8x512xf32, #tpu.memory_space<vmem>>, vector<8x512xf32>
      tpu.vector_store %arg6[%c0_15, %c0_16], %17 {strides = array<i32>} : memref<8x512xf32, #tpu.memory_space<vmem>>, vector<8x512xf32>,
    } else {
    }
    return
  }
  func.func @transform_0(%arg0: i32, %arg1: i32, %arg2: i32) -> (i32, i32) {
    %c0_i32 = arith.constant 0 : i32
    return %arg0, %arg2 : i32, i32
  }
  func.func @transform_1(%arg0: i32, %arg1: i32, %arg2: i32) -> (i32, i32) {
    %c0_i32 = arith.constant 0 : i32
    return %arg2, %arg1 : i32, i32
  }
  func.func @transform_2(%arg0: i32, %arg1: i32, %arg2: i32) -> (i32, i32) {
    %c0_i32 = arith.constant 0 : i32
    %c0_i32_0 = arith.constant 0 : i32
    return %c0_i32, %arg1 : i32, i32
  }
  func.func @transform_3(%arg0: i32, %arg1: i32, %arg2: i32) -> (i32, i32) {
    %c0_i32 = arith.constant 0 : i32
    return %arg0, %arg1 : i32, i32
  }
}

</mosaic_0001>

<bundles_post_ra>
// kernel: tpu_custom_call.1
= control target key start
LH: loop header
LB: loop body
LE: loop exit
PB: predicated region body
PF: predicated region fallthrough
CT: control target
= control target key end

     0   :  { %8 = vsyncpa [#allocation3], 0  ;;  %s1071_s0 = inlined_call_operand.hbm [shape: f32[8,512], index: 0, kind: input, shape index: {}]   ;;  %s1072_s1 = inlined_call_operand.hbm [shape: f32[512,512], index: 1, kind: input, shape index: {}]   ;;  %s1073_s2 = inlined_call_operand.vmem [shape: f32[1,512], index: 2, kind: input, shape index: {}]   ;;  %s1074_s3 = inlined_call_operand.hbm [shape: f32[8,512], index: 3, kind: output, shape index: {}]  }
   0x1   :  { %9 = vsyncpa [#allocation6], 0 }
   0x2   :  { %10 = vsyncpa [#allocation4], 0  ;;  %s1000_s12 = smov [#allocation2]   ;;  %s1001_s14 = smov [#allocation5]  }
   0x3   :  { %s17_s13 = sshll.u32 %s1000_s12, 4  ;;  %s26_s15 = sshll.u32 %s1001_s14, 4  ;;  %s18_s13 = int_to_ptr.vmem [resolvable:$true] %s17_s13  ;;  %s1025_s15 = int_to_ptr.vmem [resolvable:$true] %s26_s15 }
   0x4   :  { %s928_s18 = scalar_lea.hbm %s1071_s0, 512 }
   0x5   :  { %p929_p0 = scmp.ne.s32.totalorder %s1071_s0, %s928_s18  ;;  %p932_p1 = scmp.lt.u32.totalorder %s928_s18, %s1071_s0 }
   0x7   :  { %p934_p2 = pnand %p932_p1, %p929_p0 }
   0x9   :  { %937 = shalt.err (!%p934_p2)
}
   0xa   :  { %s938_s23 = scalar_lea.vmem %s18_s13, 512  ;;  %p943_p4 = scmp.lt.s32.totalorder %s18_s13, %s18_s13 }
   0xb   :  { %p939_p3 = scmp.ne.s32.totalorder %s18_s13, %s938_s23  ;;  %p944_p5 = scmp.lt.s32.totalorder %s938_s23, %s938_s23 }
   0xd   :  { %p945_p6 = por %p944_p5, %p943_p4 }
   0xf   :  { %p946_p7 = pnand %p945_p6, %p939_p3 }
  0x11   :  { %949 = shalt.err (!%p946_p7)
}
  0x12   :  { %20 = dma.hbm_to_vmem [thread:$0]  %s1071_s0, 512, %s18_s13, [#allocation3]  }
  0x13   :  { %s950_s28 = scalar_lea.hbm %s1072_s1, 32768 }
  0x14   :  { %p951_p8 = scmp.ne.s32.totalorder %s1072_s1, %s950_s28  ;;  %p954_p9 = scmp.lt.u32.totalorder %s950_s28, %s1072_s1 }
  0x16   :  { %p956_p10 = pnand %p954_p9, %p951_p8 }
  0x18   :  { %959 = shalt.err (!%p956_p10)
}
  0x19   :  { %s960_s6 = scalar_lea.vmem %s1025_s15, 32768  ;;  %p965_p12 = scmp.lt.s32.totalorder %s1025_s15, %s1025_s15 }
  0x1a   :  { %p961_p11 = scmp.ne.s32.totalorder %s1025_s15, %s960_s6  ;;  %p966_p13 = scmp.lt.s32.totalorder %s960_s6, %s960_s6 }
  0x1c   :  { %p967_p0 = por %p966_p13, %p965_p12 }
  0x1e   :  { %p968_p1 = pnand %p967_p0, %p961_p11 }
  0x20   :  { %971 = shalt.err (!%p968_p1)
}
  0x21   :  { %s1002_s0 = smov 512   ;;  %s1003_s7 = smov 32  }
  0x22   :  { %32 = dma.hbm_to_vmem [thread:$0]  %s1072_s1, 32768, %s1025_s15, [#allocation6], %s1002_s0, %s1002_s0, %s1003_s7  }
  0x23   :  { %994 = dma.done.wait [#allocation3], 512  }
  0x24   :  { %995 = vsyncadd [#allocation3], 4294966784 }
  0x25   :  { %996 = dma.done.wait [#allocation6], 32768  }
  0x26   :  { %997 = vsyncadd [#allocation6], 4294934528  ;;  %v58_v0 = vld [vmem:[#allocation5 + $0x8] sm:$0xff]  ;;  %v60_v2 = vld [vmem:[#allocation5 + $0x18] sm:$0xff]  ;;  %s1004_s11 = smov [#allocation7]  }
  0x27   :  { %v62_v1 = vld [vmem:[#allocation5 + $0x28] sm:$0xff]  ;;  %v64_v4 = vld [vmem:[#allocation5 + $0x38] sm:$0xff]  ;;  %v57_v5 = vld [vmem:[#allocation5] sm:$0xff]  ;;  %s652_s12 = sshll.u32 %s1004_s11, 4  ;;  %s653_s12 = int_to_ptr.vmem [resolvable:$true] %s652_s12 }
  0x28   :  { %v662_v3 = vpack.c.bf16 %v62_v1, %v58_v0  ;;  %v61_v6 = vld [vmem:[#allocation5 + $0x20] sm:$0xff]  ;;  %v790_v7 = vpack.c.bf16 %v64_v4, %v60_v2  ;;  %v59_v9 = vld [vmem:[#allocation5 + $0x10] sm:$0xff]  ;;  %v66_v11 = vld [vmem:[#allocation5 + $0x48] sm:$0xff]  ;;  %p977_p3 = scmp.lt.s32.totalorder %s653_s12, %s653_s12 }
  0x29   :  { %v664_v8 = vpack.c.bf16 %v61_v6, %v57_v5  ;;  %v63_v10 = vld [vmem:[#allocation5 + $0x30] sm:$0xff]  ;;  %v70_v13 = vld [vmem:[#allocation5 + $0x68] sm:$0xff]  ;;  %v68_v14 = vld [vmem:[#allocation5 + $0x58] sm:$0xff] }
  0x2a   :  { %663 = vmatprep.subr.bf16.mxu0 %v662_v3  ;;  %v792_v12 = vpack.c.bf16 %v63_v10, %v59_v9  ;;  %v72_v15 = vld [vmem:[#allocation5 + $0x78] sm:$0xff]  ;;  %791 = vmatprep.subr.bf16.mxu1 %v790_v7  ;;  %v666_v16 = vpack.c.bf16 %v70_v13, %v66_v11  ;;  %v65_v18 = vld [vmem:[#allocation5 + $0x40] sm:$0xff]  ;;  %v67_v20 = vld [vmem:[#allocation5 + $0x50] sm:$0xff] }
  0x2b   :  { %665 = vmatpush1.bf16.msra.mxu0 %v664_v8  ;;  %v794_v17 = vpack.c.bf16 %v72_v15, %v68_v14  ;;  %v69_v19 = vld [vmem:[#allocation5 + $0x60] sm:$0xff]  ;;  %v71_v22 = vld [vmem:[#allocation5 + $0x70] sm:$0xff]  ;;  %v74_v23 = vld [vmem:[#allocation5 + $0x88] sm:$0xff] }
  0x2c   :  { %793 = vmatpush1.bf16.msra.mxu1 %v792_v12  ;;  %v668_v21 = vpack.c.bf16 %v69_v19, %v65_v18  ;;  %v78_v24 = vld [vmem:[#allocation5 + $0xa8] sm:$0xff]  ;;  %667 = vmatprep.subr.bf16.mxu0 %v666_v16  ;;  %v796_v25 = vpack.c.bf16 %v71_v22, %v67_v20  ;;  %v76_v27 = vld [vmem:[#allocation5 + $0x98] sm:$0xff]  ;;  %v73_v29 = vld [vmem:[#allocation5 + $0x80] sm:$0xff] }
  0x2d   :  { %795 = vmatprep.subr.bf16.mxu1 %v794_v17  ;;  %v670_v26 = vpack.c.bf16 %v78_v24, %v74_v23  ;;  %v80_v28 = vld [vmem:[#allocation5 + $0xb8] sm:$0xff]  ;;  %v77_v31 = vld [vmem:[#allocation5 + $0xa0] sm:$0xff]  ;;  %v75_v32 = vld [vmem:[#allocation5 + $0x90] sm:$0xff] }
  0x2e   :  { %v798_v30 = vpack.c.bf16 %v80_v28, %v76_v27  ;;  %v79_v33 = vld [vmem:[#allocation5 + $0xb0] sm:$0xff]  ;;  %v672_v34 = vpack.c.bf16 %v77_v31, %v73_v29  ;;  %v82_v35 = vld [vmem:[#allocation5 + $0xc8] sm:$0xff]  ;;  %v84_v37 = vld [vmem:[#allocation5 + $0xd8] sm:$0xff] }
  0x2f   :  { %669 = vmatpush1.bf16.msra.mxu0 %v668_v21  ;;  %v86_v36 = vld [vmem:[#allocation5 + $0xe8] sm:$0xff]  ;;  %v800_v38 = vpack.c.bf16 %v79_v33, %v75_v32  ;;  %v88_v40 = vld [vmem:[#allocation5 + $0xf8] sm:$0xff]  ;;  %v81_v41 = vld [vmem:[#allocation5 + $0xc0] sm:$0xff] }
  0x30   :  { %797 = vmatpush1.bf16.msra.mxu1 %v796_v25  ;;  %671 = vmatprep.subr.bf16.mxu0 %v670_v26  ;;  %v674_v39 = vpack.c.bf16 %v86_v36, %v82_v35  ;;  %v85_v42 = vld [vmem:[#allocation5 + $0xe0] sm:$0xff]  ;;  %v802_v43 = vpack.c.bf16 %v88_v40, %v84_v37  ;;  %v83_v44 = vld [vmem:[#allocation5 + $0xd0] sm:$0xff]  ;;  %v90_v46 = vld [vmem:[#allocation5 + $0x108] sm:$0xff] }
  0x31   :  { %799 = vmatprep.subr.bf16.mxu1 %v798_v30  ;;  %v87_v45 = vld [vmem:[#allocation5 + $0xf0] sm:$0xff]  ;;  %v94_v47 = vld [vmem:[#allocation5 + $0x128] sm:$0xff]  ;;  %v92_v48 = vld [vmem:[#allocation5 + $0x118] sm:$0xff]  ;;  %v676_v50 = vpack.c.bf16 %v85_v42, %v81_v41 }
  0x32   :  { %v96_v49 = vld [vmem:[#allocation5 + $0x138] sm:$0xff]  ;;  %v804_v51 = vpack.c.bf16 %v87_v45, %v83_v44  ;;  %v678_v52 = vpack.c.bf16 %v94_v47, %v90_v46  ;;  %v89_v53 = vld [vmem:[#allocation5 + $0x100] sm:$0xff]  ;;  %v91_v55 = vld [vmem:[#allocation5 + $0x110] sm:$0xff] }
  0x33   :  { %673 = vmatpush1.bf16.msra.mxu0 %v672_v34  ;;  %v93_v54 = vld [vmem:[#allocation5 + $0x120] sm:$0xff]  ;;  %v806_v56 = vpack.c.bf16 %v96_v49, %v92_v48  ;;  %v95_v57 = vld [vmem:[#allocation5 + $0x130] sm:$0xff]  ;;  %v98_v58 = vld [vmem:[#allocation5 + $0x148] sm:$0xff] }
  0x34   :  { %801 = vmatpush1.bf16.msra.mxu1 %v800_v38  ;;  %675 = vmatprep.subr.bf16.mxu0 %v674_v39  ;;  %v102_v59 = vld [vmem:[#allocation5 + $0x168] sm:$0xff]  ;;  %v100_v60 = vld [vmem:[#allocation5 + $0x158] sm:$0xff]  ;;  %v680_v62 = vpack.c.bf16 %v93_v54, %v89_v53  ;;  %v808_v63 = vpack.c.bf16 %v95_v57, %v91_v55  ;;  %v97_v1 = vld [vmem:[#allocation5 + $0x140] sm:$0xff] }
  0x35   :  { %803 = vmatprep.subr.bf16.mxu1 %v802_v43  ;;  %v104_v61 = vld [vmem:[#allocation5 + $0x178] sm:$0xff]  ;;  %v682_v0 = vpack.c.bf16 %v102_v59, %v98_v58  ;;  %v101_v2 = vld [vmem:[#allocation5 + $0x160] sm:$0xff]  ;;  %v99_v3 = vld [vmem:[#allocation5 + $0x150] sm:$0xff] }
  0x36   :  { %v810_v4 = vpack.c.bf16 %v104_v61, %v100_v60  ;;  %v103_v5 = vld [vmem:[#allocation5 + $0x170] sm:$0xff]  ;;  %v106_v6 = vld [vmem:[#allocation5 + $0x188] sm:$0xff]  ;;  %v108_v8 = vld [vmem:[#allocation5 + $0x198] sm:$0xff]  ;;  %v684_v10 = vpack.c.bf16 %v101_v2, %v97_v1 }
  0x37   :  { %677 = vmatpush1.bf16.msra.mxu0 %v676_v50  ;;  %v110_v7 = vld [vmem:[#allocation5 + $0x1a8] sm:$0xff]  ;;  %v112_v9 = vld [vmem:[#allocation5 + $0x1b8] sm:$0xff]  ;;  %v812_v11 = vpack.c.bf16 %v103_v5, %v99_v3  ;;  %v105_v13 = vld [vmem:[#allocation5 + $0x180] sm:$0xff] }
  0x38   :  { %805 = vmatpush1.bf16.msra.mxu1 %v804_v51  ;;  %679 = vmatprep.subr.bf16.mxu0 %v678_v52  ;;  %v686_v12 = vpack.c.bf16 %v110_v7, %v106_v6  ;;  %v109_v14 = vld [vmem:[#allocation5 + $0x1a0] sm:$0xff]  ;;  %v107_v15 = vld [vmem:[#allocation5 + $0x190] sm:$0xff]  ;;  %v814_v16 = vpack.c.bf16 %v112_v9, %v108_v8  ;;  %v114_v18 = vld [vmem:[#allocation5 + $0x1c8] sm:$0xff] }
  0x39   :  { %807 = vmatprep.subr.bf16.mxu1 %v806_v56  ;;  %v111_v17 = vld [vmem:[#allocation5 + $0x1b0] sm:$0xff]  ;;  %v118_v19 = vld [vmem:[#allocation5 + $0x1e8] sm:$0xff]  ;;  %v116_v20 = vld [vmem:[#allocation5 + $0x1d8] sm:$0xff]  ;;  %v688_v22 = vpack.c.bf16 %v109_v14, %v105_v13 }
  0x3a   :  { %v120_v21 = vld [vmem:[#allocation5 + $0x1f8] sm:$0xff]  ;;  %v816_v23 = vpack.c.bf16 %v111_v17, %v107_v15  ;;  %v690_v24 = vpack.c.bf16 %v118_v19, %v114_v18  ;;  %v113_v25 = vld [vmem:[#allocation5 + $0x1c0] sm:$0xff]  ;;  %v115_v27 = vld [vmem:[#allocation5 + $0x1d0] sm:$0xff] }
  0x3b   :  { %681 = vmatpush1.bf16.msra.mxu0 %v680_v62  ;;  %v117_v26 = vld [vmem:[#allocation5 + $0x1e0] sm:$0xff]  ;;  %v818_v28 = vpack.c.bf16 %v120_v21, %v116_v20  ;;  %v119_v29 = vld [vmem:[#allocation5 + $0x1f0] sm:$0xff]  ;;  %v122_v30 = vld [vmem:[#allocation5 + $0x208] sm:$0xff] }
  0x3c   :  { %809 = vmatpush1.bf16.msra.mxu1 %v808_v63  ;;  %683 = vmatprep.subr.bf16.mxu0 %v682_v0  ;;  %v126_v31 = vld [vmem:[#allocation5 + $0x228] sm:$0xff]  ;;  %v124_v32 = vld [vmem:[#allocation5 + $0x218] sm:$0xff]  ;;  %v692_v34 = vpack.c.bf16 %v117_v26, %v113_v25  ;;  %v820_v35 = vpack.c.bf16 %v119_v29, %v115_v27  ;;  %v121_v37 = vld [vmem:[#allocation5 + $0x200] sm:$0xff] }
  0x3d   :  { %811 = vmatprep.subr.bf16.mxu1 %v810_v4  ;;  %v128_v33 = vld [vmem:[#allocation5 + $0x238] sm:$0xff]  ;;  %v694_v36 = vpack.c.bf16 %v126_v31, %v122_v30  ;;  %v125_v38 = vld [vmem:[#allocation5 + $0x220] sm:$0xff]  ;;  %v123_v39 = vld [vmem:[#allocation5 + $0x210] sm:$0xff] }
  0x3e   :  { %v822_v40 = vpack.c.bf16 %v128_v33, %v124_v32  ;;  %v127_v41 = vld [vmem:[#allocation5 + $0x230] sm:$0xff]  ;;  %v130_v42 = vld [vmem:[#allocation5 + $0x248] sm:$0xff]  ;;  %v132_v44 = vld [vmem:[#allocation5 + $0x258] sm:$0xff]  ;;  %v696_v46 = vpack.c.bf16 %v125_v38, %v121_v37 }
  0x3f   :  { %685 = vmatpush1.bf16.msra.mxu0 %v684_v10  ;;  %v134_v43 = vld [vmem:[#allocation5 + $0x268] sm:$0xff]  ;;  %v136_v45 = vld [vmem:[#allocation5 + $0x278] sm:$0xff]  ;;  %v824_v47 = vpack.c.bf16 %v127_v41, %v123_v39  ;;  %v129_v49 = vld [vmem:[#allocation5 + $0x240] sm:$0xff] }
  0x40   :  { %813 = vmatpush1.bf16.msra.mxu1 %v812_v11  ;;  %687 = vmatprep.subr.bf16.mxu0 %v686_v12  ;;  %v698_v48 = vpack.c.bf16 %v134_v43, %v130_v42  ;;  %v133_v50 = vld [vmem:[#allocation5 + $0x260] sm:$0xff]  ;;  %v131_v51 = vld [vmem:[#allocation5 + $0x250] sm:$0xff]  ;;  %v826_v52 = vpack.c.bf16 %v136_v45, %v132_v44  ;;  %v138_v54 = vld [vmem:[#allocation5 + $0x288] sm:$0xff] }
  0x41   :  { %815 = vmatprep.subr.bf16.mxu1 %v814_v16  ;;  %v135_v53 = vld [vmem:[#allocation5 + $0x270] sm:$0xff]  ;;  %v142_v55 = vld [vmem:[#allocation5 + $0x2a8] sm:$0xff]  ;;  %v140_v56 = vld [vmem:[#allocation5 + $0x298] sm:$0xff]  ;;  %v700_v58 = vpack.c.bf16 %v133_v50, %v129_v49 }
  0x42   :  { %v144_v57 = vld [vmem:[#allocation5 + $0x2b8] sm:$0xff]  ;;  %v828_v59 = vpack.c.bf16 %v135_v53, %v131_v51  ;;  %v702_v60 = vpack.c.bf16 %v142_v55, %v138_v54  ;;  %v137_v61 = vld [vmem:[#allocation5 + $0x280] sm:$0xff]  ;;  %v139_v63 = vld [vmem:[#allocation5 + $0x290] sm:$0xff] }
  0x43   :  { %689 = vmatpush1.bf16.msra.mxu0 %v688_v22  ;;  %v141_v62 = vld [vmem:[#allocation5 + $0x2a0] sm:$0xff]  ;;  %v830_v0 = vpack.c.bf16 %v144_v57, %v140_v56  ;;  %v143_v1 = vld [vmem:[#allocation5 + $0x2b0] sm:$0xff]  ;;  %v146_v2 = vld [vmem:[#allocation5 + $0x2c8] sm:$0xff] }
  0x44   :  { %817 = vmatpush1.bf16.msra.mxu1 %v816_v23  ;;  %691 = vmatprep.subr.bf16.mxu0 %v690_v24  ;;  %v150_v3 = vld [vmem:[#allocation5 + $0x2e8] sm:$0xff]  ;;  %v148_v4 = vld [vmem:[#allocation5 + $0x2d8] sm:$0xff]  ;;  %v704_v6 = vpack.c.bf16 %v141_v62, %v137_v61  ;;  %v145_v7 = vld [vmem:[#allocation5 + $0x2c0] sm:$0xff]  ;;  %v832_v8 = vpack.c.bf16 %v143_v1, %v139_v63 }
  0x45   :  { %819 = vmatprep.subr.bf16.mxu1 %v818_v28  ;;  %v152_v5 = vld [vmem:[#allocation5 + $0x2f8] sm:$0xff]  ;;  %v706_v9 = vpack.c.bf16 %v150_v3, %v146_v2  ;;  %v149_v10 = vld [vmem:[#allocation5 + $0x2e0] sm:$0xff]  ;;  %v147_v11 = vld [vmem:[#allocation5 + $0x2d0] sm:$0xff] }
  0x46   :  { %v151_v12 = vld [vmem:[#allocation5 + $0x2f0] sm:$0xff]  ;;  %v834_v13 = vpack.c.bf16 %v152_v5, %v148_v4  ;;  %v154_v14 = vld [vmem:[#allocation5 + $0x308] sm:$0xff]  ;;  %v156_v17 = vld [vmem:[#allocation5 + $0x318] sm:$0xff]  ;;  %v708_v19 = vpack.c.bf16 %v149_v10, %v145_v7 }
  0x47   :  { %693 = vmatpush1.bf16.msra.mxu0 %v692_v34  ;;  %v158_v15 = vld [vmem:[#allocation5 + $0x328] sm:$0xff]  ;;  %v160_v18 = vld [vmem:[#allocation5 + $0x338] sm:$0xff]  ;;  %v836_v20 = vpack.c.bf16 %v151_v12, %v147_v11  ;;  %v153_v22 = vld [vmem:[#allocation5 + $0x300] sm:$0xff] }
  0x48   :  { %821 = vmatpush1.bf16.msra.mxu1 %v820_v35  ;;  %695 = vmatprep.subr.bf16.mxu0 %v694_v36  ;;  %v54_v16 = vld [vmem:[#allocation2 + $0x8] sm:$0xff]  ;;  %v710_v21 = vpack.c.bf16 %v158_v15, %v154_v14  ;;  %v157_v23 = vld [vmem:[#allocation5 + $0x320] sm:$0xff]  ;;  %v155_v24 = vld [vmem:[#allocation5 + $0x310] sm:$0xff]  ;;  %v838_v25 = vpack.c.bf16 %v160_v18, %v156_v17 }
  0x49   :  { %823 = vmatprep.subr.bf16.mxu1 %v822_v40  ;;  %377 = vmatprep.mubr.f32.mxu0 %v54_v16  ;;  %v159_v26 = vld [vmem:[#allocation5 + $0x330] sm:$0xff]  ;;  %v162_v27 = vld [vmem:[#allocation5 + $0x348] sm:$0xff]  ;;  %v164_v29 = vld [vmem:[#allocation5 + $0x358] sm:$0xff]  ;;  %v712_v31 = vpack.c.bf16 %v157_v23, %v153_v22 }
  0x4a   :  { %519 = vmatprep.mubr.f32.mxu1 %v54_v16  ;;  %v166_v28 = vld [vmem:[#allocation5 + $0x368] sm:$0xff]  ;;  %v168_v30 = vld [vmem:[#allocation5 + $0x378] sm:$0xff]  ;;  %v840_v32 = vpack.c.bf16 %v159_v26, %v155_v24  ;;  %v161_v34 = vld [vmem:[#allocation5 + $0x340] sm:$0xff] }
  0x4b   :  { %697 = vmatpush1.bf16.msra.mxu0 %v696_v46  ;;  %v714_v33 = vpack.c.bf16 %v166_v28, %v162_v27  ;;  %v165_v35 = vld [vmem:[#allocation5 + $0x360] sm:$0xff]  ;;  %v163_v36 = vld [vmem:[#allocation5 + $0x350] sm:$0xff]  ;;  %v842_v37 = vpack.c.bf16 %v168_v30, %v164_v29  ;;  %v170_v39 = vld [vmem:[#allocation5 + $0x388] sm:$0xff] }
  0x4c   :  { %825 = vmatpush1.bf16.msra.mxu1 %v824_v47  ;;  %699 = vmatprep.subr.bf16.mxu0 %v698_v48  ;;  %v167_v38 = vld [vmem:[#allocation5 + $0x370] sm:$0xff]  ;;  %v174_v40 = vld [vmem:[#allocation5 + $0x3a8] sm:$0xff]  ;;  %v172_v41 = vld [vmem:[#allocation5 + $0x398] sm:$0xff]  ;;  %v716_v43 = vpack.c.bf16 %v165_v35, %v161_v34 }
  0x4d   :  { %827 = vmatprep.subr.bf16.mxu1 %v826_v52  ;;  %v176_v42 = vld [vmem:[#allocation5 + $0x3b8] sm:$0xff]  ;;  %v844_v44 = vpack.c.bf16 %v167_v38, %v163_v36  ;;  %v718_v45 = vpack.c.bf16 %v174_v40, %v170_v39  ;;  %v169_v46 = vld [vmem:[#allocation5 + $0x380] sm:$0xff]  ;;  %v171_v48 = vld [vmem:[#allocation5 + $0x390] sm:$0xff] }
  0x4e   :  { %v173_v47 = vld [vmem:[#allocation5 + $0x3a0] sm:$0xff]  ;;  %v846_v49 = vpack.c.bf16 %v176_v42, %v172_v41  ;;  %v175_v50 = vld [vmem:[#allocation5 + $0x3b0] sm:$0xff]  ;;  %v178_v51 = vld [vmem:[#allocation5 + $0x3c8] sm:$0xff] }
  0x4f   :  { %701 = vmatpush1.bf16.msra.mxu0 %v700_v58  ;;  %v182_v52 = vld [vmem:[#allocation5 + $0x3e8] sm:$0xff]  ;;  %v180_v53 = vld [vmem:[#allocation5 + $0x3d8] sm:$0xff]  ;;  %v720_v55 = vpack.c.bf16 %v173_v47, %v169_v46  ;;  %v848_v56 = vpack.c.bf16 %v175_v50, %v171_v48  ;;  %v177_v58 = vld [vmem:[#allocation5 + $0x3c0] sm:$0xff] }
  0x50   :  { %829 = vmatpush1.bf16.msra.mxu1 %v828_v59  ;;  %703 = vmatprep.subr.bf16.mxu0 %v702_v60  ;;  %v184_v54 = vld [vmem:[#allocation5 + $0x3f8] sm:$0xff]  ;;  %v722_v57 = vpack.c.bf16 %v182_v52, %v178_v51  ;;  %v181_v59 = vld [vmem:[#allocation5 + $0x3e0] sm:$0xff]  ;;  %v179_v60 = vld [vmem:[#allocation5 + $0x3d0] sm:$0xff] }
  0x51   :  { %831 = vmatprep.subr.bf16.mxu1 %v830_v0  ;;  %v850_v61 = vpack.c.bf16 %v184_v54, %v180_v53  ;;  %v183_v62 = vld [vmem:[#allocation5 + $0x3f0] sm:$0xff]  ;;  %v186_v63 = vld [vmem:[#allocation5 + $0x408] sm:$0xff]  ;;  %v188_v1 = vld [vmem:[#allocation5 + $0x418] sm:$0xff]  ;;  %v724_v3 = vpack.c.bf16 %v181_v59, %v177_v58 }
  0x52   :  { %v190_v0 = vld [vmem:[#allocation5 + $0x428] sm:$0xff]  ;;  %v192_v2 = vld [vmem:[#allocation5 + $0x438] sm:$0xff]  ;;  %v852_v4 = vpack.c.bf16 %v183_v62, %v179_v60  ;;  %v189_v7 = vld [vmem:[#allocation5 + $0x420] sm:$0xff] }
  0x53   :  { %705 = vmatpush1.bf16.msra.mxu0 %v704_v6  ;;  %v726_v5 = vpack.c.bf16 %v190_v0, %v186_v63  ;;  %v185_v6 = vld [vmem:[#allocation5 + $0x400] sm:$0xff]  ;;  %v191_v10 = vld [vmem:[#allocation5 + $0x430] sm:$0xff]  ;;  %v194_v11 = vld [vmem:[#allocation5 + $0x448] sm:$0xff] }
  0x54   :  { %833 = vmatpush1.bf16.msra.mxu1 %v832_v8  ;;  %707 = vmatprep.subr.bf16.mxu0 %v706_v9  ;;  %v187_v8 = vld [vmem:[#allocation5 + $0x410] sm:$0xff]  ;;  %v854_v9 = vpack.c.bf16 %v192_v2, %v188_v1  ;;  %v198_v12 = vld [vmem:[#allocation5 + $0x468] sm:$0xff]  ;;  %v200_v14 = vld [vmem:[#allocation5 + $0x478] sm:$0xff]  ;;  %v728_v16 = vpack.c.bf16 %v189_v7, %v185_v6 }
  0x55   :  { %835 = vmatprep.subr.bf16.mxu1 %v834_v13  ;;  %v196_v13 = vld [vmem:[#allocation5 + $0x458] sm:$0xff]  ;;  %v53_v15 = vld [vmem:[#allocation2] sm:$0xff]  ;;  %v856_v17 = vpack.c.bf16 %v191_v10, %v187_v8  ;;  %v730_v18 = vpack.c.bf16 %v198_v12, %v194_v11  ;;  %v199_v23 = vld [vmem:[#allocation5 + $0x470] sm:$0xff] }
  0x56   :  { %v858_v22 = vpack.c.bf16 %v200_v14, %v196_v13  ;;  %v202_v24 = vld [vmem:[#allocation5 + $0x488] sm:$0xff]  ;;  %v204_v26 = vld [vmem:[#allocation5 + $0x498] sm:$0xff]  ;;  %v207_v35 = vld [vmem:[#allocation5 + $0x4b0] sm:$0xff] }
  0x57   :  { %709 = vmatpush1.bf16.msra.mxu0 %v708_v19  ;;  %v193_v19 = vld [vmem:[#allocation5 + $0x440] sm:$0xff]  ;;  %v208_v27 = vld [vmem:[#allocation5 + $0x4b8] sm:$0xff]  ;;  %v210_v36 = vld [vmem:[#allocation5 + $0x4c8] sm:$0xff] }
  0x58   :  { %837 = vmatpush1.bf16.msra.mxu1 %v836_v20  ;;  %711 = vmatprep.subr.bf16.mxu0 %v710_v21  ;;  %v197_v20 = vld [vmem:[#allocation5 + $0x460] sm:$0xff]  ;;  %v195_v21 = vld [vmem:[#allocation5 + $0x450] sm:$0xff]  ;;  %v862_v34 = vpack.c.bf16 %v208_v27, %v204_v26  ;;  %v212_v38 = vld [vmem:[#allocation5 + $0x4d8] sm:$0xff] }
  0x59   :  { %839 = vmatprep.subr.bf16.mxu1 %v838_v25  ;;  %v206_v25 = vld [vmem:[#allocation5 + $0x4a8] sm:$0xff]  ;;  %v732_v28 = vpack.c.bf16 %v197_v20, %v193_v19  ;;  %v860_v29 = vpack.c.bf16 %v199_v23, %v195_v21  ;;  %v216_v39 = vld [vmem:[#allocation5 + $0x4f8] sm:$0xff]  ;;  %v215_v47 = vld [vmem:[#allocation5 + $0x4f0] sm:$0xff] }
  0x5a   :  { %v734_v30 = vpack.c.bf16 %v206_v25, %v202_v24  ;;  %v866_v46 = vpack.c.bf16 %v216_v39, %v212_v38  ;;  %v218_v48 = vld [vmem:[#allocation5 + $0x508] sm:$0xff]  ;;  %v220_v50 = vld [vmem:[#allocation5 + $0x518] sm:$0xff]  ;;  %v223_v59 = vld [vmem:[#allocation5 + $0x530] sm:$0xff] }
  0x5b   :  { %713 = vmatpush1.bf16.msra.mxu0 %v712_v31  ;;  %v201_v31 = vld [vmem:[#allocation5 + $0x480] sm:$0xff]  ;;  %v224_v51 = vld [vmem:[#allocation5 + $0x538] sm:$0xff]  ;;  %v226_v60 = vld [vmem:[#allocation5 + $0x548] sm:$0xff] }
  0x5c   :  { %841 = vmatpush1.bf16.msra.mxu1 %v840_v32  ;;  %715 = vmatprep.subr.bf16.mxu0 %v714_v33  ;;  %v205_v32 = vld [vmem:[#allocation5 + $0x4a0] sm:$0xff]  ;;  %v203_v33 = vld [vmem:[#allocation5 + $0x490] sm:$0xff]  ;;  %v870_v58 = vpack.c.bf16 %v224_v51, %v220_v50  ;;  %v228_v62 = vld [vmem:[#allocation5 + $0x558] sm:$0xff] }
  0x5d   :  { %843 = vmatprep.subr.bf16.mxu1 %v842_v37  ;;  %v214_v37 = vld [vmem:[#allocation5 + $0x4e8] sm:$0xff]  ;;  %v736_v40 = vpack.c.bf16 %v205_v32, %v201_v31  ;;  %v864_v41 = vpack.c.bf16 %v207_v35, %v203_v33  ;;  %v232_v63 = vld [vmem:[#allocation5 + $0x578] sm:$0xff]  ;;  %v231_v7 = vld [vmem:[#allocation5 + $0x570] sm:$0xff] }
  0x5e   :  { %v738_v42 = vpack.c.bf16 %v214_v37, %v210_v36  ;;  %v874_v6 = vpack.c.bf16 %v232_v63, %v228_v62  ;;  %v234_v8 = vld [vmem:[#allocation5 + $0x588] sm:$0xff]  ;;  %v236_v10 = vld [vmem:[#allocation5 + $0x598] sm:$0xff]  ;;  %v233_v13 = vld [vmem:[#allocation5 + $0x580] sm:$0xff] }
  0x5f   :  { %717 = vmatpush1.bf16.msra.mxu0 %v716_v43  ;;  %v209_v43 = vld [vmem:[#allocation5 + $0x4c0] sm:$0xff]  ;;  %v240_v11 = vld [vmem:[#allocation5 + $0x5b8] sm:$0xff]  ;;  %v242_v20 = vld [vmem:[#allocation5 + $0x5c8] sm:$0xff] }
  0x60   :  { %845 = vmatpush1.bf16.msra.mxu1 %v844_v44  ;;  %719 = vmatprep.subr.bf16.mxu0 %v718_v45  ;;  %v213_v44 = vld [vmem:[#allocation5 + $0x4e0] sm:$0xff]  ;;  %v211_v45 = vld [vmem:[#allocation5 + $0x4d0] sm:$0xff]  ;;  %v878_v19 = vpack.c.bf16 %v240_v11, %v236_v10  ;;  %v246_v21 = vld [vmem:[#allocation5 + $0x5e8] sm:$0xff] }
  0x61   :  { %847 = vmatprep.subr.bf16.mxu1 %v846_v49  ;;  %v222_v49 = vld [vmem:[#allocation5 + $0x528] sm:$0xff]  ;;  %v740_v52 = vpack.c.bf16 %v213_v44, %v209_v43  ;;  %v868_v53 = vpack.c.bf16 %v215_v47, %v211_v45  ;;  %v244_v23 = vld [vmem:[#allocation5 + $0x5d8] sm:$0xff]  ;;  %v754_v27 = vpack.c.bf16 %v246_v21, %v242_v20  ;;  %v247_v32 = vld [vmem:[#allocation5 + $0x5f0] sm:$0xff] }
  0x62   :  { %v742_v54 = vpack.c.bf16 %v222_v49, %v218_v48  ;;  %v248_v24 = vld [vmem:[#allocation5 + $0x5f8] sm:$0xff]  ;;  %v250_v33 = vld [vmem:[#allocation5 + $0x608] sm:$0xff]  ;;  %v255_v44 = vld [vmem:[#allocation5 + $0x630] sm:$0xff] }
  0x63   :  { %721 = vmatpush1.bf16.msra.mxu0 %v720_v55  ;;  %v217_v55 = vld [vmem:[#allocation5 + $0x500] sm:$0xff]  ;;  %v882_v31 = vpack.c.bf16 %v248_v24, %v244_v23  ;;  %v252_v35 = vld [vmem:[#allocation5 + $0x618] sm:$0xff]  ;;  %v258_v45 = vld [vmem:[#allocation5 + $0x648] sm:$0xff] }
  0x64   :  { %849 = vmatpush1.bf16.msra.mxu1 %v848_v56  ;;  %723 = vmatprep.subr.bf16.mxu0 %v722_v57  ;;  %v221_v56 = vld [vmem:[#allocation5 + $0x520] sm:$0xff]  ;;  %v219_v57 = vld [vmem:[#allocation5 + $0x510] sm:$0xff]  ;;  %v256_v36 = vld [vmem:[#allocation5 + $0x638] sm:$0xff] }
  0x65   :  { %851 = vmatprep.subr.bf16.mxu1 %v850_v61  ;;  %v230_v61 = vld [vmem:[#allocation5 + $0x568] sm:$0xff]  ;;  %v744_v0 = vpack.c.bf16 %v221_v56, %v217_v55  ;;  %v872_v1 = vpack.c.bf16 %v223_v59, %v219_v57  ;;  %v886_v43 = vpack.c.bf16 %v256_v36, %v252_v35  ;;  %v260_v47 = vld [vmem:[#allocation5 + $0x658] sm:$0xff]  ;;  %v263_v56 = vld [vmem:[#allocation5 + $0x670] sm:$0xff] }
  0x66   :  { %v746_v2 = vpack.c.bf16 %v230_v61, %v226_v60  ;;  %v264_v48 = vld [vmem:[#allocation5 + $0x678] sm:$0xff]  ;;  %v266_v57 = vld [vmem:[#allocation5 + $0x688] sm:$0xff]  ;;  %v281_v24 = vld [vmem:[#allocation5 + $0x700] sm:$0xff] }
  0x67   :  { %725 = vmatpush1.bf16.msra.mxu0 %v724_v3  ;;  %v225_v3 = vld [vmem:[#allocation5 + $0x540] sm:$0xff]  ;;  %v890_v55 = vpack.c.bf16 %v264_v48, %v260_v47  ;;  %v268_v59 = vld [vmem:[#allocation5 + $0x698] sm:$0xff] }
  0x68   :  { %853 = vmatpush1.bf16.msra.mxu1 %v852_v4  ;;  %727 = vmatprep.subr.bf16.mxu0 %v726_v5  ;;  %v229_v4 = vld [vmem:[#allocation5 + $0x560] sm:$0xff]  ;;  %v227_v5 = vld [vmem:[#allocation5 + $0x550] sm:$0xff]  ;;  %v272_v60 = vld [vmem:[#allocation5 + $0x6b8] sm:$0xff] }
  0x69   :  { %855 = vmatprep.subr.bf16.mxu1 %v854_v9  ;;  %v238_v9 = vld [vmem:[#allocation5 + $0x5a8] sm:$0xff]  ;;  %v748_v12 = vpack.c.bf16 %v229_v4, %v225_v3  ;;  %v876_v14 = vpack.c.bf16 %v231_v7, %v227_v5  ;;  %v894_v3 = vpack.c.bf16 %v272_v60, %v268_v59  ;;  %v271_v4 = vld [vmem:[#allocation5 + $0x6b0] sm:$0xff]  ;;  %v276_v7 = vld [vmem:[#allocation5 + $0x6d8] sm:$0xff] }
  0x6a   :  { %378 = vmatmul.mubr.f32.vlgmr.msra.gmra.mrb[0].mxu0 %v53_v15  ;;  %v274_v5 = vld [vmem:[#allocation5 + $0x6c8] sm:$0xff]  ;;  %v288_v20 = vld [vmem:[#allocation5 + $0x738] sm:$0xff]  ;;  %v289_v36 = vld [vmem:[#allocation5 + $0x740] sm:$0xff] }
  0x6b   :  { %729 = vmatpush1.bf16.msra.mxu0 %v728_v16  ;;  %520 = vmatmul.mubr.f32.vlgmr.msra.gmra.mrb[0].mxu1 %v53_v15  ;;  %v750_v15 = vpack.c.bf16 %v238_v9, %v234_v8  ;;  %v237_v16 = vld [vmem:[#allocation5 + $0x5a0] sm:$0xff]  ;;  %v280_v8 = vld [vmem:[#allocation5 + $0x6f8] sm:$0xff] }
  0x6c   :  { %857 = vmatpush1.bf16.msra.mxu1 %v856_v17  ;;  %731 = vmatprep.subr.bf16.mxu0 %v730_v18  ;;  %v235_v17 = vld [vmem:[#allocation5 + $0x590] sm:$0xff]  ;;  %v752_v25 = vpack.c.bf16 %v237_v16, %v233_v13  ;;  %v277_v13 = vld [vmem:[#allocation5 + $0x6e0] sm:$0xff] }
  0x6d   :  { %859 = vmatprep.subr.bf16.mxu1 %v858_v22  ;;  %v239_v18 = vld [vmem:[#allocation5 + $0x5b0] sm:$0xff]  ;;  %v56_v22 = vld [vmem:[#allocation2 + $0x18] sm:$0xff]  ;;  %v297_v48 = vld [vmem:[#allocation5 + $0x780] sm:$0xff] }
  0x6e   :  { %448 = vmatprep.mubr.f32.mxu0 %v56_v22  ;;  %590 = vmatprep.mubr.f32.mxu1 %v56_v22  ;;  %v880_v26 = vpack.c.bf16 %v239_v18, %v235_v17  ;;  %v279_v16 = vld [vmem:[#allocation5 + $0x6f0] sm:$0xff]  ;;  %v282_v17 = vld [vmem:[#allocation5 + $0x708] sm:$0xff]  ;;  %v305_v60 = vld [vmem:[#allocation5 + $0x7c0] sm:$0xff] }
  0x6f   :  { %733 = vmatpush1.bf16.msra.mxu0 %v732_v28  ;;  %v241_v28 = vld [vmem:[#allocation5 + $0x5c0] sm:$0xff]  ;;  %v286_v18 = vld [vmem:[#allocation5 + $0x728] sm:$0xff] }
  0x70   :  { %861 = vmatpush1.bf16.msra.mxu1 %v860_v29  ;;  %735 = vmatprep.subr.bf16.mxu0 %v734_v30  ;;  %v245_v29 = vld [vmem:[#allocation5 + $0x5e0] sm:$0xff]  ;;  %v243_v30 = vld [vmem:[#allocation5 + $0x5d0] sm:$0xff]  ;;  %v774_v23 = vpack.c.bf16 %v286_v18, %v282_v17 }
  0x71   :  { %863 = vmatprep.subr.bf16.mxu1 %v862_v34  ;;  %v254_v34 = vld [vmem:[#allocation5 + $0x628] sm:$0xff]  ;;  %v756_v37 = vpack.c.bf16 %v245_v29, %v241_v28  ;;  %v884_v38 = vpack.c.bf16 %v247_v32, %v243_v30  ;;  %v287_v28 = vld [vmem:[#allocation5 + $0x730] sm:$0xff]  ;;  %v296_v32 = vld [vmem:[#allocation5 + $0x778] sm:$0xff] }
  0x72   :  { %v758_v39 = vpack.c.bf16 %v254_v34, %v250_v33  ;;  %v290_v29 = vld [vmem:[#allocation5 + $0x748] sm:$0xff] }
  0x73   :  { %737 = vmatpush1.bf16.msra.mxu0 %v736_v40  ;;  %v249_v40 = vld [vmem:[#allocation5 + $0x600] sm:$0xff]  ;;  %v294_v30 = vld [vmem:[#allocation5 + $0x768] sm:$0xff] }
  0x74   :  { %865 = vmatpush1.bf16.msra.mxu1 %v864_v41  ;;  %739 = vmatprep.subr.bf16.mxu0 %v738_v42  ;;  %v253_v41 = vld [vmem:[#allocation5 + $0x620] sm:$0xff]  ;;  %v251_v42 = vld [vmem:[#allocation5 + $0x610] sm:$0xff]  ;;  %v778_v35 = vpack.c.bf16 %v294_v30, %v290_v29 }
  0x75   :  { %867 = vmatprep.subr.bf16.mxu1 %v866_v46  ;;  %v262_v46 = vld [vmem:[#allocation5 + $0x668] sm:$0xff]  ;;  %v760_v49 = vpack.c.bf16 %v253_v41, %v249_v40  ;;  %v888_v50 = vpack.c.bf16 %v255_v44, %v251_v42  ;;  %v295_v40 = vld [vmem:[#allocation5 + $0x770] sm:$0xff]  ;;  %v304_v44 = vld [vmem:[#allocation5 + $0x7b8] sm:$0xff] }
  0x76   :  { %v762_v51 = vpack.c.bf16 %v262_v46, %v258_v45  ;;  %v298_v41 = vld [vmem:[#allocation5 + $0x788] sm:$0xff] }
  0x77   :  { %741 = vmatpush1.bf16.msra.mxu0 %v740_v52  ;;  %v257_v52 = vld [vmem:[#allocation5 + $0x640] sm:$0xff]  ;;  %v302_v42 = vld [vmem:[#allocation5 + $0x7a8] sm:$0xff] }
  0x78   :  { %869 = vmatpush1.bf16.msra.mxu1 %v868_v53  ;;  %743 = vmatprep.subr.bf16.mxu0 %v742_v54  ;;  %v261_v53 = vld [vmem:[#allocation5 + $0x660] sm:$0xff]  ;;  %v259_v54 = vld [vmem:[#allocation5 + $0x650] sm:$0xff]  ;;  %v782_v47 = vpack.c.bf16 %v302_v42, %v298_v41 }
  0x79   :  { %871 = vmatprep.subr.bf16.mxu1 %v870_v58  ;;  %v270_v58 = vld [vmem:[#allocation5 + $0x6a8] sm:$0xff]  ;;  %v764_v61 = vpack.c.bf16 %v261_v53, %v257_v52  ;;  %v892_v62 = vpack.c.bf16 %v263_v56, %v259_v54  ;;  %v303_v52 = vld [vmem:[#allocation5 + $0x7b0] sm:$0xff]  ;;  %v312_v56 = vld [vmem:[#allocation5 + $0x7f8] sm:$0xff] }
  0x7a   :  { %v766_v63 = vpack.c.bf16 %v270_v58, %v266_v57  ;;  %v306_v53 = vld [vmem:[#allocation5 + $0x7c8] sm:$0xff] }
  0x7b   :  { %745 = vmatpush1.bf16.msra.mxu0 %v744_v0  ;;  %v265_v0 = vld [vmem:[#allocation5 + $0x680] sm:$0xff]  ;;  %v310_v54 = vld [vmem:[#allocation5 + $0x7e8] sm:$0xff] }
  0x7c   :  { %873 = vmatpush1.bf16.msra.mxu1 %v872_v1  ;;  %747 = vmatprep.subr.bf16.mxu0 %v746_v2  ;;  %v269_v1 = vld [vmem:[#allocation5 + $0x6a0] sm:$0xff]  ;;  %v267_v2 = vld [vmem:[#allocation5 + $0x690] sm:$0xff]  ;;  %v786_v59 = vpack.c.bf16 %v310_v54, %v306_v53 }
  0x7d   :  { %875 = vmatprep.subr.bf16.mxu1 %v874_v6  ;;  %v278_v6 = vld [vmem:[#allocation5 + $0x6e8] sm:$0xff]  ;;  %v768_v9 = vpack.c.bf16 %v269_v1, %v265_v0  ;;  %v896_v10 = vpack.c.bf16 %v271_v4, %v267_v2  ;;  %v311_v0 = vld [vmem:[#allocation5 + $0x7f0] sm:$0xff]  ;;  %v614_v4 = vlaneseq }
  0x7e   :  { %v770_v11 = vpack.c.bf16 %v278_v6, %v274_v5 }
  0x7f   :  { %749 = vmatpush1.bf16.msra.mxu0 %v748_v12  ;;  %v273_v12 = vld [vmem:[#allocation5 + $0x6c0] sm:$0xff]  ;;  %v615_v5 = vshrl.u32 %v614_v4, 7 }
  0x80   :  { %877 = vmatpush1.bf16.msra.mxu1 %v876_v14  ;;  %751 = vmatprep.subr.bf16.mxu0 %v750_v15  ;;  %v275_v14 = vld [vmem:[#allocation5 + $0x6d0] sm:$0xff]  ;;  %v898_v15 = vpack.c.bf16 %v280_v8, %v276_v7  ;;  %v772_v21 = vpack.c.bf16 %v277_v13, %v273_v12  ;;  %v612_v7 = vld [vmem:[%s1073_s2] sm:$0xf]  ;;  %s972_s2 = scalar_lea.vmem %s653_s12, 512 }
  0x81   :  { %879 = vmatprep.subr.bf16.mxu1 %v878_v19  ;;  %v284_v19 = vld [vmem:[#allocation5 + $0x718] sm:$0xff]  ;;  %v900_v22 = vpack.c.bf16 %v279_v16, %v275_v14  ;;  %v616_v6 = vsub.s32 0, %v615_v5  ;;  %v620_v8 = vsub.s32 1, %v615_v5  ;;  %p973_p2 = scmp.ne.s32.totalorder %s653_s12, %s972_s2  ;;  %p978_p4 = scmp.lt.s32.totalorder %s972_s2, %s972_s2 }
  0x83   :  { %753 = vmatpush1.bf16.msra.mxu0 %v752_v25  ;;  %v285_v25 = vld [vmem:[#allocation5 + $0x720] sm:$0xff]  ;;  %v621_v13 = vrot.slane %v612_v7, %v620_v8  ;;  %p979_p5 = por %p978_p4, %p977_p3 }
  0x84   :  { %881 = vmatpush1.bf16.msra.mxu1 %v880_v26  ;;  %755 = vmatprep.subr.bf16.mxu0 %v754_v27  ;;  %v283_v26 = vld [vmem:[#allocation5 + $0x710] sm:$0xff]  ;;  %v902_v27 = vpack.c.bf16 %v288_v20, %v284_v19  ;;  %v776_v33 = vpack.c.bf16 %v285_v25, %v281_v24 }
  0x85   :  { %883 = vmatprep.subr.bf16.mxu1 %v882_v31  ;;  %v292_v31 = vld [vmem:[#allocation5 + $0x758] sm:$0xff]  ;;  %v904_v34 = vpack.c.bf16 %v287_v28, %v283_v26  ;;  %p980_p6 = pnand %p979_p5, %p973_p2 }
  0x87   :  { %757 = vmatpush1.bf16.msra.mxu0 %v756_v37  ;;  %v293_v37 = vld [vmem:[#allocation5 + $0x760] sm:$0xff] }
  0x88   :  { %885 = vmatpush1.bf16.msra.mxu1 %v884_v38  ;;  %759 = vmatprep.subr.bf16.mxu0 %v758_v39  ;;  %v291_v38 = vld [vmem:[#allocation5 + $0x750] sm:$0xff]  ;;  %v906_v39 = vpack.c.bf16 %v296_v32, %v292_v31  ;;  %v780_v45 = vpack.c.bf16 %v293_v37, %v289_v36 }
  0x89   :  { %887 = vmatprep.subr.bf16.mxu1 %v886_v43  ;;  %v300_v43 = vld [vmem:[#allocation5 + $0x798] sm:$0xff]  ;;  %v908_v46 = vpack.c.bf16 %v295_v40, %v291_v38 }
  0x8b   :  { %761 = vmatpush1.bf16.msra.mxu0 %v760_v49  ;;  %v301_v49 = vld [vmem:[#allocation5 + $0x7a0] sm:$0xff] }
  0x8c   :  { %889 = vmatpush1.bf16.msra.mxu1 %v888_v50  ;;  %763 = vmatprep.subr.bf16.mxu0 %v762_v51  ;;  %v299_v50 = vld [vmem:[#allocation5 + $0x790] sm:$0xff]  ;;  %v910_v51 = vpack.c.bf16 %v304_v44, %v300_v43  ;;  %v784_v57 = vpack.c.bf16 %v301_v49, %v297_v48 }
  0x8d   :  { %891 = vmatprep.subr.bf16.mxu1 %v890_v55  ;;  %v308_v55 = vld [vmem:[#allocation5 + $0x7d8] sm:$0xff]  ;;  %v912_v58 = vpack.c.bf16 %v303_v52, %v299_v50 }
  0x8f   :  { %765 = vmatpush1.bf16.msra.mxu0 %v764_v61  ;;  %v309_v61 = vld [vmem:[#allocation5 + $0x7e0] sm:$0xff] }
  0x90   :  { %893 = vmatpush1.bf16.msra.mxu1 %v892_v62  ;;  %767 = vmatprep.subr.bf16.mxu0 %v766_v63  ;;  %v914_v62 = vpack.c.bf16 %v312_v56, %v308_v55  ;;  %v307_v63 = vld [vmem:[#allocation5 + $0x7d0] sm:$0xff]  ;;  %v788_v1 = vpack.c.bf16 %v309_v61, %v305_v60 }
  0x91   :  { %895 = vmatprep.subr.bf16.mxu1 %v894_v3  ;;  %v916_v2 = vpack.c.bf16 %v311_v0, %v307_v63  ;;  %v55_v3 = vld [vmem:[#allocation2 + $0x10] sm:$0xff] }
  0x93   :  { %769 = vmatpush1.bf16.msra.mxu0 %v768_v9  ;;  %v624_v9 = vsub.s32 2, %v615_v5 }
  0x94   :  { %897 = vmatpush1.bf16.msra.mxu1 %v896_v10  ;;  %771 = vmatprep.subr.bf16.mxu0 %v770_v11  ;;  %v628_v10 = vsub.s32 3, %v615_v5  ;;  %v617_v11 = vrot.slane %v612_v7, %v616_v6 }
  0x95   :  { %899 = vmatprep.subr.bf16.mxu1 %v898_v15  ;;  %v625_v14 = vrot.slane %v612_v7, %v624_v9 }
  0x96   :  { %v629_v17 = vrot.slane %v612_v7, %v628_v10 }
  0x97   :  { %773 = vmatpush1.bf16.msra.mxu0 %v772_v21 }
  0x98   :  { %901 = vmatpush1.bf16.msra.mxu1 %v900_v22  ;;  %775 = vmatprep.subr.bf16.mxu0 %v774_v23 }
  0x99   :  { %903 = vmatprep.subr.bf16.mxu1 %v902_v27 }
  0x9b   :  { %777 = vmatpush1.bf16.msra.mxu0 %v776_v33 }
  0x9c   :  { %905 = vmatpush1.bf16.msra.mxu1 %v904_v34  ;;  %779 = vmatprep.subr.bf16.mxu0 %v778_v35 }
  0x9d   :  { %907 = vmatprep.subr.bf16.mxu1 %v906_v39 }
  0x9f   :  { %781 = vmatpush1.bf16.msra.mxu0 %v780_v45 }
  0xa0   :  { %909 = vmatpush1.bf16.msra.mxu1 %v908_v46  ;;  %783 = vmatprep.subr.bf16.mxu0 %v782_v47 }
  0xa1   :  { %911 = vmatprep.subr.bf16.mxu1 %v910_v51 }
  0xa3   :  { %785 = vmatpush1.bf16.msra.mxu0 %v784_v57 }
  0xa4   :  { %913 = vmatpush1.bf16.msra.mxu1 %v912_v58  ;;  %787 = vmatprep.subr.bf16.mxu0 %v786_v59 }
  0xa5   :  { %915 = vmatprep.subr.bf16.mxu1 %v914_v62 }
  0xa7   :  { %789 = vmatpush1.bf16.msra.mxu0 %v788_v1 }
  0xa8   :  { %917 = vmatpush1.bf16.msra.mxu1 %v916_v2 }
  0xaa   :  { %449 = vmatmul.mubr.f32.vlgmr.msra.gmra.mrb[0].mxu0 %v55_v3 }
  0xab   :  { %591 = vmatmul.mubr.f32.vlgmr.msra.gmra.mrb[0].mxu1 %v55_v3 }
 0x17d   :  { %v450_v12 = vpop.f32.mrb[0].mxu0 }
 0x17e   :  { %v592_v15 = vpop.f32.mrb[0].mxu1  ;;  %v452_v16 = vpop.f32.mrb[1].mxu0  ;;  %v634_v19 = vadd.f32 %v617_v11, %v450_v12 }
 0x17f   :  { %v594_v18 = vpop.f32.mrb[1].mxu1  ;;  %v635_v20 = vadd.f32 %v621_v13, %v452_v16  ;;  %v636_v21 = vadd.f32 %v625_v14, %v592_v15 }
 0x180   :  { %v637_v22 = vadd.f32 %v629_v17, %v594_v18  ;;  %v638_v23 = vmax.f32 %v634_v19, 0.0 }
 0x181   :  { %v639_v24 = vmax.f32 %v635_v20, 0.0  ;;  %v640_v25 = vmax.f32 %v636_v21, 0.0 }
 0x182   :  { %v641_v26 = vmax.f32 %v637_v22, 0.0  ;;  %642 = vst [vmem:[#allocation7] sm:$0xff] %v638_v23 }
 0x183   :  { %643 = vst [vmem:[#allocation7 + $0x8] sm:$0xff] %v639_v24  ;;  %644 = vst [vmem:[#allocation7 + $0x10] sm:$0xff] %v640_v25 }
 0x184   :  { %645 = vst [vmem:[#allocation7 + $0x18] sm:$0xff] %v641_v26 }
 0x185   :  { %983 = shalt.err (!%p980_p6)
}
 0x186   :  { %s984_s15 = scalar_lea.hbm %s1074_s3, 512 }
 0x187   :  { %p985_p7 = scmp.ne.s32.totalorder %s1074_s3, %s984_s15  ;;  %p988_p8 = scmp.lt.u32.totalorder %s984_s15, %s1074_s3 }
 0x189   :  { %p990_p9 = pnand %p988_p8, %p985_p7 }
 0x18b   :  { %993 = shalt.err (!%p990_p9)
}
 0x18c   :  { %655 = dma.vmem_to_hbm [thread:$0]  %s653_s12, 512, %s1074_s3, [#allocation4]  }
 0x18d   :  { %998 = dma.done.wait [#allocation4], 512  }
 0x18e   :  { %999 = vsyncadd [#allocation4], 4294966784 }
 0x18f   :  { %659 = vsyncpa [#allocation3], 1 }
 0x190   :  { %660 = vsyncpa [#allocation6], 1 }
 0x191   :  { %661 = vsyncpa [#allocation4], 1 }

</bundles_post_ra>
